<compile_context>
chip_gen: v5e
topology: v5e:2x2
jax: 0.10.0
libtpu: 0.0.40
codegen_flags: <defaults>
</compile_context>

<pallas_src>
import math

import jax
import jax.numpy as jnp
from jax import lax
from jax.experimental import pallas as pl
from jax.experimental.pallas import tpu as pltpu

N_HEAD = 4                     # decoder_config.n_head == encoder_config.n_head
MATMUL_DTYPE = jnp.bfloat16    # MXU operands; accumulation / softmax stay f32
NEG_INF = -1e30


def _round_up(x, m):
    return ((x + m - 1) // m) * m


# ---------------------------------- Pallas kernel ----------------------------------

def _make_cross_attention_kernel(Te_pad, tile_td, C, n_head):
    H = n_head
    hd = C // H

    def kernel(dec_ref, enc_ref, mask_ref,
               qw_ref, qb_ref,      # decoder_c_attn (scale folded): (C, C) bf16, (1, C) f32
               kvw_ref, kvb_ref,    # encoder_c_attn fused K|V:      (C, 2C) bf16, (1, 2C) f32
               pw_ref, pb_ref,      # c_proj:                        (C, C) bf16, (1, C) f32
               out_ref,             # (tile_td, C)
               kv_scratch,          # (Te_pad, 2C) f32 — persists across Td tiles of one batch row
               y_scratch):          # (tile_td, C)  f32 — concat-heads buffer fed to c_proj
        t = pl.program_id(1)

        # Encoder K/V projection once per batch row; Td tiles of the same b reuse it.
        @pl.when(t == 0)
        def _():
            enc = enc_ref[...].astype(MATMUL_DTYPE)                       # (Te_pad, C)
            kv = jnp.dot(enc, kvw_ref[...],
                         preferred_element_type=jnp.float32) + kvb_ref[...]
            kv_scratch[...] = kv                                          # (Te_pad, 2C)

        # Full-width Q projection (single lane-dense N=C matmul; 1/sqrt(hd) already folded in).
        dec = dec_ref[...].astype(MATMUL_DTYPE)                           # (tile_td, C)
        q = jnp.dot(dec, qw_ref[...],
                    preferred_element_type=jnp.float32) + qb_ref[...]     # (tile_td, C) f32

        mask = mask_ref[...]                                              # (1, Te_pad) additive key mask

        for h in range(H):   # static unroll; at C=512 these are 128-aligned lane slices
            qh = q[:, h * hd:(h + 1) * hd].astype(MATMUL_DTYPE)                 # (tile_td, hd)
            kh = kv_scratch[:, h * hd:(h + 1) * hd].astype(MATMUL_DTYPE)        # (Te_pad, hd)
            vh = kv_scratch[:, C + h * hd:C + (h + 1) * hd].astype(MATMUL_DTYPE)

            # q @ k^T via dot_general (contract last dims; no explicit transpose).
            s = lax.dot_general(qh, kh, (((1,), (1,)), ((), ())),
                                preferred_element_type=jnp.float32)       # (tile_td, Te_pad)
            s = s + mask
            s = s - jnp.max(s, axis=-1, keepdims=True)
            p = jnp.exp(s)
            p = p * pl.reciprocal(jnp.sum(p, axis=-1, keepdims=True), approx=True)
            att = jnp.dot(p.astype(MATMUL_DTYPE), vh,
                          preferred_element_type=jnp.float32)             # (tile_td, hd)

            # "concat heads": write this head's output into its lane slice of the c_proj input.
            y_scratch[:, h * hd:(h + 1) * hd] = att

        # One lane-dense K=C c_proj matmul instead of H K=hd matmuls + H full-slab adds.
        y = jnp.dot(y_scratch[...].astype(MATMUL_DTYPE), pw_ref[...],
                    preferred_element_type=jnp.float32) + pb_ref[...]
        out_ref[...] = y.astype(out_ref.dtype)

    return kernel


# ---------------------------------- wrapper ----------------------------------

def prepare_params(params, n_head=N_HEAD):
    """Pack / pre-cast parameters ONCE (not on every forward call)."""
    C = params["dec_w"].shape[0]
    hd = C // n_head
    scale = 1.0 / math.sqrt(hd)
    return {
        "qw": (params["dec_w"] * scale).astype(MATMUL_DTYPE),   # fold 1/sqrt(hd) into Q proj
        "qb": (params["dec_b"] * scale).astype(jnp.float32),
        "kvw": params["enc_w"].astype(MATMUL_DTYPE),             # fused (C, 2C) K|V weights
        "kvb": params["enc_b"].astype(jnp.float32),
        "pw": params["proj_w"].astype(MATMUL_DTYPE),
        "pb": params["proj_b"].astype(jnp.float32),
    }


def cross_attention(encoder_x, decoder_x, packed, n_head=N_HEAD):
    """Pallas forward of CrossAttention. `packed` comes from prepare_params()."""
    B, Te, C = encoder_x.shape
    Bd, Td, Cd = decoder_x.shape
    assert B == Bd and C == Cd and C % n_head == 0

    # Lane-dense score dimension: pad encoder length to a multiple of 128; mask the pad.
    Te_pad = _round_up(Te, 128)
    tile_td = 128 if Td >= 128 else _round_up(Td, 8)
    Td_pad = _round_up(Td, tile_td)

    if Te_pad != Te:
        encoder_x = jnp.pad(encoder_x, ((0, 0), (0, Te_pad - Te), (0, 0)))
    if Td_pad != Td:
        decoder_x = jnp.pad(decoder_x, ((0, 0), (0, Td_pad - Td), (0, 0)))

    key_mask = jnp.where(jnp.arange(Te_pad) < Te, 0.0, NEG_INF)
    key_mask = key_mask.astype(jnp.float32).reshape(1, Te_pad)

    grid = (B, Td_pad // tile_td)
    kernel = _make_cross_attention_kernel(Te_pad, tile_td, C, n_head)

    out = pl.pallas_call(
        kernel,
        out_shape=jax.ShapeDtypeStruct((B, Td_pad, C), decoder_x.dtype),
        grid=grid,
        in_specs=[
            pl.BlockSpec((None, tile_td, C), lambda b, t: (b, t, 0)),   # decoder rows (tiled)
            pl.BlockSpec((None, Te_pad, C), lambda b, t: (b, 0, 0)),    # encoder rows (per b)
            pl.BlockSpec((1, Te_pad), lambda b, t: (0, 0)),             # additive key mask
            pl.BlockSpec((C, C), lambda b, t: (0, 0)),                  # qw
            pl.BlockSpec((1, C), lambda b, t: (0, 0)),                  # qb
            pl.BlockSpec((C, 2 * C), lambda b, t: (0, 0)),              # kvw
            pl.BlockSpec((1, 2 * C), lambda b, t: (0, 0)),              # kvb
            pl.BlockSpec((C, C), lambda b, t: (0, 0)),                  # pw
            pl.BlockSpec((1, C), lambda b, t: (0, 0)),                  # pb
        ],
        out_specs=pl.BlockSpec((None, tile_td, C), lambda b, t: (b, t, 0)),
        scratch_shapes=[
            pltpu.VMEM((Te_pad, 2 * C), jnp.float32),   # K|V of the current batch row
            pltpu.VMEM((tile_td, C), jnp.float32),      # concat-heads buffer
        ],
        compiler_params=pltpu.CompilerParams(
            dimension_semantics=("parallel", "arbitrary"),   # batch across TCs; Td tiles carry KV scratch
            vmem_limit_bytes=64 * 1024 * 1024,
        ),
    )(decoder_x, encoder_x, key_mask,
      packed["qw"], packed["qb"], packed["kvw"], packed["kvb"],
      packed["pw"], packed["pb"])

    if Td_pad != Td:
        out = out[:, :Td, :]
    return out


# ---------------------------------- reference (pure JAX) ----------------------------------

def ref_cross_attention(encoder_x, decoder_x, params, n_head=N_HEAD):
    B, Te, C = encoder_x.shape
    _, Td, _ = decoder_x.shape
    hd = C // n_head
    q = decoder_x @ params["dec_w"] + params["dec_b"]
    kv = encoder_x @ params["enc_w"] + params["enc_b"]
    k, v = kv[..., :C], kv[..., C:]
    q = q.reshape(B, Td, n_head, hd).transpose(0, 2, 1, 3)
    k = k.reshape(B, Te, n_head, hd).transpose(0, 2, 1, 3)
    v = v.reshape(B, Te, n_head, hd).transpose(0, 2, 1, 3)
    s = jnp.einsum("bhqd,bhkd->bhqk", q, k) / math.sqrt(hd)
    p = jax.nn.softmax(s, axis=-1)
    y = jnp.einsum("bhqk,bhkd->bhqd", p, v)
    y = y.transpose(0, 2, 1, 3).reshape(B, Td, C)
    return y @ params["proj_w"] + params["proj_b"]


# ---------------------------------- params ----------------------------------

def init_params(key, C):
    ks = jax.random.split(key, 6)

    def lin(kw, kb, fi, fo):
        w = jax.random.normal(kw, (fi, fo), jnp.float32) / math.sqrt(fi)
        b = 0.1 * jax.random.normal(kb, (1, fo), jnp.float32)
        return w, b

    P = {}
    P["enc_w"], P["enc_b"] = lin(ks[0], ks[1], C, 2 * C)   # encoder_c_attn
    P["dec_w"], P["dec_b"] = lin(ks[2], ks[3], C, C)       # decoder_c_attn
    P["proj_w"], P["proj_b"] = lin(ks[4], ks[5], C, C)     # c_proj
    return P


if __name__ == "__main__":
    key = jax.random.PRNGKey(0)
    B, Te, Td, C = 2, 16, 8, 32   # batch, encoder seq, decoder seq, hidden (n_head=4, hd=8)
    k1, k2, k3 = jax.random.split(key, 3)
    enc_x = jax.random.normal(k1, (B, Te, C), jnp.float32)
    dec_x = jax.random.normal(k2, (B, Td, C), jnp.float32)
    params = init_params(k3, C)
    packed = prepare_params(params)

    out = cross_attention(enc_x, dec_x, packed)
    out = jax.block_until_ready(out)

    ref = ref_cross_attention(enc_x, dec_x, params)
    assert out.shape == (B, Td, C)
    max_err = float(jnp.max(jnp.abs(out - ref)))
    # bf16 MXU operands (+ approx-reciprocal softmax) vs f32 reference.
    assert jnp.allclose(out, ref, rtol=3e-2, atol=3e-2), max_err

    print("KERNEL_OK")
</pallas_src>

<mosaic_0001>
module attributes {stable_mosaic.version = 11 : i64} {
  func.func @kernel(%arg0: i32, %arg1: i32, %arg2: memref<1x8x32xf32, #tpu.memory_space<vmem>>, %arg3: memref<1x128x32xf32, #tpu.memory_space<vmem>>, %arg4: memref<1x128xf32, #tpu.memory_space<vmem>>, %arg5: memref<32x32xbf16, #tpu.memory_space<vmem>>, %arg6: memref<1x32xf32, #tpu.memory_space<vmem>>, %arg7: memref<32x64xbf16, #tpu.memory_space<vmem>>, %arg8: memref<1x64xf32, #tpu.memory_space<vmem>>, %arg9: memref<32x32xbf16, #tpu.memory_space<vmem>>, %arg10: memref<1x32xf32, #tpu.memory_space<vmem>>, %arg11: memref<1x8x32xf32, #tpu.memory_space<vmem>>, %arg12: memref<128x64xf32, #tpu.memory_space<vmem>>, %arg13: memref<8x32xf32, #tpu.memory_space<vmem>>) attributes {dimension_semantics = [#tpu.dimension_semantics<parallel>, #tpu.dimension_semantics<arbitrary>], iteration_bounds = array<i64: 2, 1>, scalar_prefetch = 0 : i64, scratch_operands = 2 : i64, tpu.core_type = #tpu.core_type<tc>, window_params = [{transform_indices = @transform_0, window_bounds = array<i64: 1, 8, 32>}, {transform_indices = @transform_1, window_bounds = array<i64: 1, 128, 32>}, {pipeline_mode = #tpu.pipeline_mode<synchronous>, transform_indices = @transform_2, window_bounds = array<i64: 1, 128>}, {pipeline_mode = #tpu.pipeline_mode<synchronous>, transform_indices = @transform_3, window_bounds = array<i64: 32, 32>}, {pipeline_mode = #tpu.pipeline_mode<synchronous>, transform_indices = @transform_4, window_bounds = array<i64: 1, 32>}, {pipeline_mode = #tpu.pipeline_mode<synchronous>, transform_indices = @transform_5, window_bounds = array<i64: 32, 64>}, {pipeline_mode = #tpu.pipeline_mode<synchronous>, transform_indices = @transform_6, window_bounds = array<i64: 1, 64>}, {pipeline_mode = #tpu.pipeline_mode<synchronous>, transform_indices = @transform_7, window_bounds = array<i64: 32, 32>}, {pipeline_mode = #tpu.pipeline_mode<synchronous>, transform_indices = @transform_8, window_bounds = array<i64: 1, 32>}, {transform_indices = @transform_9, window_bounds = array<i64: 1, 8, 32>}]} {
    %c0_i32 = arith.constant 0 : i32
    %0 = arith.cmpi eq, %arg1, %c0_i32 : i32
    %1 = arith.extui %0 : i1 to i32
    %c0_i32_0 = arith.constant 0 : i32
    %2 = arith.cmpi ne, %1, %c0_i32_0 : i32
    scf.if %2 {
      %c0_52 = arith.constant 0 : index
      %c0_53 = arith.constant 0 : index
      %c0_54 = arith.constant 0 : index
      %110 = vector.load %arg3[%c0_52, %c0_53, %c0_54] : memref<1x128x32xf32, #tpu.memory_space<vmem>>, vector<1x128x32xf32>
      %111 = vector.shape_cast %110 : vector<1x128x32xf32> to vector<128x32xf32>
      %112 = arith.truncf %111 : vector<128x32xf32> to vector<128x32xbf16>
      %c0_55 = arith.constant 0 : index
      %c0_56 = arith.constant 0 : index
      %113 = vector.load %arg7[%c0_55, %c0_56] : memref<32x64xbf16, #tpu.memory_space<vmem>>, vector<32x64xbf16>
      %cst_57 = arith.constant dense<0.000000e+00> : vector<128x64xf32>
      %114 = tpu.matmul %112, %113, %cst_57 {dimension_numbers = #tpu.dot_dimension_numbers<[1], [0], [0], [1], [0, 0, 1, 1], [], []>} : vector<128x32xbf16>, vector<32x64xbf16>, vector<128x64xf32> -> vector<128x64xf32>
      %c0_58 = arith.constant 0 : index
      %c0_59 = arith.constant 0 : index
      %115 = vector.load %arg8[%c0_58, %c0_59] : memref<1x64xf32, #tpu.memory_space<vmem>>, vector<1x64xf32>
      %116 = vector.broadcast %115 : vector<1x64xf32> to vector<128x64xf32>
      %117 = arith.addf %114, %116 : vector<128x64xf32>
      %c0_60 = arith.constant 0 : index
      %c0_61 = arith.constant 0 : index
      %118 = vector.load %arg12[%c0_60, %c0_61] : memref<128x64xf32, #tpu.memory_space<vmem>>, vector<128x64xf32>
      tpu.vector_store %arg12[%c0_60, %c0_61], %117 {strides = array<i32>} : memref<128x64xf32, #tpu.memory_space<vmem>>, vector<128x64xf32>,
    } else {
    }
    %c0 = arith.constant 0 : index
    %c0_1 = arith.constant 0 : index
    %c0_2 = arith.constant 0 : index
    %3 = vector.load %arg2[%c0, %c0_1, %c0_2] : memref<1x8x32xf32, #tpu.memory_space<vmem>>, vector<1x8x32xf32>
    %4 = vector.shape_cast %3 : vector<1x8x32xf32> to vector<8x32xf32>
    %5 = arith.truncf %4 : vector<8x32xf32> to vector<8x32xbf16>
    %c0_3 = arith.constant 0 : index
    %c0_4 = arith.constant 0 : index
    %6 = vector.load %arg5[%c0_3, %c0_4] : memref<32x32xbf16, #tpu.memory_space<vmem>>, vector<32x32xbf16>
    %cst = arith.constant dense<0.000000e+00> : vector<8x32xf32>
    %7 = tpu.matmul %5, %6, %cst {dimension_numbers = #tpu.dot_dimension_numbers<[1], [0], [0], [1], [0, 0, 1, 1], [], []>} : vector<8x32xbf16>, vector<32x32xbf16>, vector<8x32xf32> -> vector<8x32xf32>
    %c0_5 = arith.constant 0 : index
    %c0_6 = arith.constant 0 : index
    %8 = vector.load %arg6[%c0_5, %c0_6] : memref<1x32xf32, #tpu.memory_space<vmem>>, vector<1x32xf32>
    %9 = vector.broadcast %8 : vector<1x32xf32> to vector<8x32xf32>
    %10 = arith.addf %7, %9 : vector<8x32xf32>
    %c0_7 = arith.constant 0 : index
    %c0_8 = arith.constant 0 : index
    %11 = vector.load %arg4[%c0_7, %c0_8] : memref<1x128xf32, #tpu.memory_space<vmem>>, vector<1x128xf32>
    %12 = vector.extract_strided_slice %10 {offsets = [0, 0], sizes = [8, 8], strides = [1, 1]} : vector<8x32xf32> to vector<8x8xf32>
    %13 = arith.truncf %12 : vector<8x8xf32> to vector<8x8xbf16>
    %c0_9 = arith.constant 0 : index
    %c0_10 = arith.constant 0 : index
    %14 = vector.load %arg12[%c0_9, %c0_10] : memref<128x64xf32, #tpu.memory_space<vmem>>, vector<128x8xf32>
    %15 = arith.truncf %14 : vector<128x8xf32> to vector<128x8xbf16>
    %c0_11 = arith.constant 0 : index
    %c32 = arith.constant 32 : index
    %16 = vector.load %arg12[%c0_11, %c32] : memref<128x64xf32, #tpu.memory_space<vmem>>, vector<128x8xf32>
    %17 = arith.truncf %16 : vector<128x8xf32> to vector<128x8xbf16>
    %cst_12 = arith.constant dense<0.000000e+00> : vector<8x128xf32>
    %18 = tpu.matmul %13, %15, %cst_12 {dimension_numbers = #tpu.dot_dimension_numbers<[1], [1], [0], [0], [0, 0, 1, 0], [], []>} : vector<8x8xbf16>, vector<128x8xbf16>, vector<8x128xf32> -> vector<8x128xf32>
    %19 = vector.broadcast %11 : vector<1x128xf32> to vector<8x128xf32>
    %20 = arith.addf %18, %19 : vector<8x128xf32>
    %cst_13 = arith.constant dense<0xFF800000> : vector<8xf32>
    %21 = vector.multi_reduction <maximumf>, %20, %cst_13 [1] : vector<8x128xf32> to vector<8xf32>
    %22 = vector.shape_cast %21 : vector<8xf32> to vector<8x1xf32>
    %23 = vector.broadcast %22 : vector<8x1xf32> to vector<8x128xf32>
    %24 = arith.subf %20, %23 : vector<8x128xf32>
    %25 = math.exp %24 : vector<8x128xf32>
    %cst_14 = arith.constant dense<0.000000e+00> : vector<8xf32>
    %26 = vector.multi_reduction <add>, %25, %cst_14 [1] : vector<8x128xf32> to vector<8xf32>
    %27 = vector.shape_cast %26 : vector<8xf32> to vector<8x1xf32>
    %28 = tpu.reciprocal %27 {approx = true} : vector<8x1xf32> -> vector<8x1xf32>
    %29 = vector.broadcast %28 : vector<8x1xf32> to vector<8x128xf32>
    %30 = arith.mulf %25, %29 : vector<8x128xf32>
    %31 = arith.truncf %30 : vector<8x128xf32> to vector<8x128xbf16>
    %cst_15 = arith.constant dense<0.000000e+00> : vector<8x8xf32>
    %32 = tpu.matmul %31, %17, %cst_15 {dimension_numbers = #tpu.dot_dimension_numbers<[1], [0], [0], [1], [0, 0, 1, 1], [], []>} : vector<8x128xbf16>, vector<128x8xbf16>, vector<8x8xf32> -> vector<8x8xf32>
    %c0_16 = arith.constant 0 : index
    %c0_17 = arith.constant 0 : index
    %33 = vector.load %arg13[%c0_16, %c0_17] : memref<8x32xf32, #tpu.memory_space<vmem>>, vector<8x8xf32>
    tpu.vector_store %arg13[%c0_16, %c0_17], %32 {strides = array<i32>} : memref<8x32xf32, #tpu.memory_space<vmem>>, vector<8x8xf32>,
    %34 = vector.extract_strided_slice %10 {offsets = [0, 8], sizes = [8, 8], strides = [1, 1]} : vector<8x32xf32> to vector<8x8xf32>
    %35 = arith.truncf %34 : vector<8x8xf32> to vector<8x8xbf16>
    %c0_18 = arith.constant 0 : index
    %c8 = arith.constant 8 : index
    %36 = vector.load %arg12[%c0_18, %c8] : memref<128x64xf32, #tpu.memory_space<vmem>>, vector<128x8xf32>
    %37 = arith.truncf %36 : vector<128x8xf32> to vector<128x8xbf16>
    %c0_19 = arith.constant 0 : index
    %c40 = arith.constant 40 : index
    %38 = vector.load %arg12[%c0_19, %c40] : memref<128x64xf32, #tpu.memory_space<vmem>>, vector<128x8xf32>
    %39 = arith.truncf %38 : vector<128x8xf32> to vector<128x8xbf16>
    %cst_20 = arith.constant dense<0.000000e+00> : vector<8x128xf32>
    %40 = tpu.matmul %35, %37, %cst_20 {dimension_numbers = #tpu.dot_dimension_numbers<[1], [1], [0], [0], [0, 0, 1, 0], [], []>} : vector<8x8xbf16>, vector<128x8xbf16>, vector<8x128xf32> -> vector<8x128xf32>
    %41 = vector.broadcast %11 : vector<1x128xf32> to vector<8x128xf32>
    %42 = arith.addf %40, %41 : vector<8x128xf32>
    %cst_21 = arith.constant dense<0xFF800000> : vector<8xf32>
    %43 = vector.multi_reduction <maximumf>, %42, %cst_21 [1] : vector<8x128xf32> to vector<8xf32>
    %44 = vector.shape_cast %43 : vector<8xf32> to vector<8x1xf32>
    %45 = vector.broadcast %44 : vector<8x1xf32> to vector<8x128xf32>
    %46 = arith.subf %42, %45 : vector<8x128xf32>
    %47 = math.exp %46 : vector<8x128xf32>
    %cst_22 = arith.constant dense<0.000000e+00> : vector<8xf32>
    %48 = vector.multi_reduction <add>, %47, %cst_22 [1] : vector<8x128xf32> to vector<8xf32>
    %49 = vector.shape_cast %48 : vector<8xf32> to vector<8x1xf32>
    %50 = tpu.reciprocal %49 {approx = true} : vector<8x1xf32> -> vector<8x1xf32>
    %51 = vector.broadcast %50 : vector<8x1xf32> to vector<8x128xf32>
    %52 = arith.mulf %47, %51 : vector<8x128xf32>
    %53 = arith.truncf %52 : vector<8x128xf32> to vector<8x128xbf16>
    %cst_23 = arith.constant dense<0.000000e+00> : vector<8x8xf32>
    %54 = tpu.matmul %53, %39, %cst_23 {dimension_numbers = #tpu.dot_dimension_numbers<[1], [0], [0], [1], [0, 0, 1, 1], [], []>} : vector<8x128xbf16>, vector<128x8xbf16>, vector<8x8xf32> -> vector<8x8xf32>
    %c0_24 = arith.constant 0 : index
    %c8_25 = arith.constant 8 : index
    %55 = vector.load %arg13[%c0_24, %c8_25] : memref<8x32xf32, #tpu.memory_space<vmem>>, vector<8x8xf32>
    tpu.vector_store %arg13[%c0_24, %c8_25], %54 {strides = array<i32>} : memref<8x32xf32, #tpu.memory_space<vmem>>, vector<8x8xf32>,
    %56 = vector.extract_strided_slice %10 {offsets = [0, 16], sizes = [8, 8], strides = [1, 1]} : vector<8x32xf32> to vector<8x8xf32>
    %57 = arith.truncf %56 : vector<8x8xf32> to vector<8x8xbf16>
    %c0_26 = arith.constant 0 : index
    %c16 = arith.constant 16 : index
    %58 = vector.load %arg12[%c0_26, %c16] : memref<128x64xf32, #tpu.memory_space<vmem>>, vector<128x8xf32>
    %59 = arith.truncf %58 : vector<128x8xf32> to vector<128x8xbf16>
    %c0_27 = arith.constant 0 : index
    %c48 = arith.constant 48 : index
    %60 = vector.load %arg12[%c0_27, %c48] : memref<128x64xf32, #tpu.memory_space<vmem>>, vector<128x8xf32>
    %61 = arith.truncf %60 : vector<128x8xf32> to vector<128x8xbf16>
    %cst_28 = arith.constant dense<0.000000e+00> : vector<8x128xf32>
    %62 = tpu.matmul %57, %59, %cst_28 {dimension_numbers = #tpu.dot_dimension_numbers<[1], [1], [0], [0], [0, 0, 1, 0], [], []>} : vector<8x8xbf16>, vector<128x8xbf16>, vector<8x128xf32> -> vector<8x128xf32>
    %63 = vector.broadcast %11 : vector<1x128xf32> to vector<8x128xf32>
    %64 = arith.addf %62, %63 : vector<8x128xf32>
    %cst_29 = arith.constant dense<0xFF800000> : vector<8xf32>
    %65 = vector.multi_reduction <maximumf>, %64, %cst_29 [1] : vector<8x128xf32> to vector<8xf32>
    %66 = vector.shape_cast %65 : vector<8xf32> to vector<8x1xf32>
    %67 = vector.broadcast %66 : vector<8x1xf32> to vector<8x128xf32>
    %68 = arith.subf %64, %67 : vector<8x128xf32>
    %69 = math.exp %68 : vector<8x128xf32>
    %cst_30 = arith.constant dense<0.000000e+00> : vector<8xf32>
    %70 = vector.multi_reduction <add>, %69, %cst_30 [1] : vector<8x128xf32> to vector<8xf32>
    %71 = vector.shape_cast %70 : vector<8xf32> to vector<8x1xf32>
    %72 = tpu.reciprocal %71 {approx = true} : vector<8x1xf32> -> vector<8x1xf32>
    %73 = vector.broadcast %72 : vector<8x1xf32> to vector<8x128xf32>
    %74 = arith.mulf %69, %73 : vector<8x128xf32>
    %75 = arith.truncf %74 : vector<8x128xf32> to vector<8x128xbf16>
    %cst_31 = arith.constant dense<0.000000e+00> : vector<8x8xf32>
    %76 = tpu.matmul %75, %61, %cst_31 {dimension_numbers = #tpu.dot_dimension_numbers<[1], [0], [0], [1], [0, 0, 1, 1], [], []>} : vector<8x128xbf16>, vector<128x8xbf16>, vector<8x8xf32> -> vector<8x8xf32>
    %c0_32 = arith.constant 0 : index
    %c16_33 = arith.constant 16 : index
    %77 = vector.load %arg13[%c0_32, %c16_33] : memref<8x32xf32, #tpu.memory_space<vmem>>, vector<8x8xf32>
    tpu.vector_store %arg13[%c0_32, %c16_33], %76 {strides = array<i32>} : memref<8x32xf32, #tpu.memory_space<vmem>>, vector<8x8xf32>,
    %78 = vector.extract_strided_slice %10 {offsets = [0, 24], sizes = [8, 8], strides = [1, 1]} : vector<8x32xf32> to vector<8x8xf32>
    %79 = arith.truncf %78 : vector<8x8xf32> to vector<8x8xbf16>
    %c0_34 = arith.constant 0 : index
    %c24 = arith.constant 24 : index
    %80 = vector.load %arg12[%c0_34, %c24] : memref<128x64xf32, #tpu.memory_space<vmem>>, vector<128x8xf32>
    %81 = arith.truncf %80 : vector<128x8xf32> to vector<128x8xbf16>
    %c0_35 = arith.constant 0 : index
    %c56 = arith.constant 56 : index
    %82 = vector.load %arg12[%c0_35, %c56] : memref<128x64xf32, #tpu.memory_space<vmem>>, vector<128x8xf32>
    %83 = arith.truncf %82 : vector<128x8xf32> to vector<128x8xbf16>
    %cst_36 = arith.constant dense<0.000000e+00> : vector<8x128xf32>
    %84 = tpu.matmul %79, %81, %cst_36 {dimension_numbers = #tpu.dot_dimension_numbers<[1], [1], [0], [0], [0, 0, 1, 0], [], []>} : vector<8x8xbf16>, vector<128x8xbf16>, vector<8x128xf32> -> vector<8x128xf32>
    %85 = vector.broadcast %11 : vector<1x128xf32> to vector<8x128xf32>
    %86 = arith.addf %84, %85 : vector<8x128xf32>
    %cst_37 = arith.constant dense<0xFF800000> : vector<8xf32>
    %87 = vector.multi_reduction <maximumf>, %86, %cst_37 [1] : vector<8x128xf32> to vector<8xf32>
    %88 = vector.shape_cast %87 : vector<8xf32> to vector<8x1xf32>
    %89 = vector.broadcast %88 : vector<8x1xf32> to vector<8x128xf32>
    %90 = arith.subf %86, %89 : vector<8x128xf32>
    %91 = math.exp %90 : vector<8x128xf32>
    %cst_38 = arith.constant dense<0.000000e+00> : vector<8xf32>
    %92 = vector.multi_reduction <add>, %91, %cst_38 [1] : vector<8x128xf32> to vector<8xf32>
    %93 = vector.shape_cast %92 : vector<8xf32> to vector<8x1xf32>
    %94 = tpu.reciprocal %93 {approx = true} : vector<8x1xf32> -> vector<8x1xf32>
    %95 = vector.broadcast %94 : vector<8x1xf32> to vector<8x128xf32>
    %96 = arith.mulf %91, %95 : vector<8x128xf32>
    %97 = arith.truncf %96 : vector<8x128xf32> to vector<8x128xbf16>
    %cst_39 = arith.constant dense<0.000000e+00> : vector<8x8xf32>
    %98 = tpu.matmul %97, %83, %cst_39 {dimension_numbers = #tpu.dot_dimension_numbers<[1], [0], [0], [1], [0, 0, 1, 1], [], []>} : vector<8x128xbf16>, vector<128x8xbf16>, vector<8x8xf32> -> vector<8x8xf32>
    %c0_40 = arith.constant 0 : index
    %c24_41 = arith.constant 24 : index
    %99 = vector.load %arg13[%c0_40, %c24_41] : memref<8x32xf32, #tpu.memory_space<vmem>>, vector<8x8xf32>
    tpu.vector_store %arg13[%c0_40, %c24_41], %98 {strides = array<i32>} : memref<8x32xf32, #tpu.memory_space<vmem>>, vector<8x8xf32>,
    %c0_42 = arith.constant 0 : index
    %c0_43 = arith.constant 0 : index
    %100 = vector.load %arg13[%c0_42, %c0_43] : memref<8x32xf32, #tpu.memory_space<vmem>>, vector<8x32xf32>
    %101 = arith.truncf %100 : vector<8x32xf32> to vector<8x32xbf16>
    %c0_44 = arith.constant 0 : index
    %c0_45 = arith.constant 0 : index
    %102 = vector.load %arg9[%c0_44, %c0_45] : memref<32x32xbf16, #tpu.memory_space<vmem>>, vector<32x32xbf16>
    %cst_46 = arith.constant dense<0.000000e+00> : vector<8x32xf32>
    %103 = tpu.matmul %101, %102, %cst_46 {dimension_numbers = #tpu.dot_dimension_numbers<[1], [0], [0], [1], [0, 0, 1, 1], [], []>} : vector<8x32xbf16>, vector<32x32xbf16>, vector<8x32xf32> -> vector<8x32xf32>
    %c0_47 = arith.constant 0 : index
    %c0_48 = arith.constant 0 : index
    %104 = vector.load %arg10[%c0_47, %c0_48] : memref<1x32xf32, #tpu.memory_space<vmem>>, vector<1x32xf32>
    %105 = vector.broadcast %104 : vector<1x32xf32> to vector<8x32xf32>
    %106 = arith.addf %103, %105 : vector<8x32xf32>
    %c0_49 = arith.constant 0 : index
    %c0_50 = arith.constant 0 : index
    %c0_51 = arith.constant 0 : index
    %107 = vector.load %arg11[%c0_49, %c0_50, %c0_51] : memref<1x8x32xf32, #tpu.memory_space<vmem>>, vector<1x8x32xf32>
    %108 = vector.shape_cast %107 : vector<1x8x32xf32> to vector<8x32xf32>
    %109 = vector.shape_cast %106 : vector<8x32xf32> to vector<1x8x32xf32>
    tpu.vector_store %arg11[%c0_49, %c0_50, %c0_51], %109 {strides = array<i32>} : memref<1x8x32xf32, #tpu.memory_space<vmem>>, vector<1x8x32xf32>,
    return
  }
  func.func @transform_0(%arg0: i32, %arg1: i32) -> (i32, i32, i32) {
    %c0_i32 = arith.constant 0 : i32
    %c0_i32_0 = arith.constant 0 : i32
    return %arg0, %arg1, %c0_i32 : i32, i32, i32
  }
  func.func @transform_1(%arg0: i32, %arg1: i32) -> (i32, i32, i32) {
    %c0_i32 = arith.constant 0 : i32
    %c0_i32_0 = arith.constant 0 : i32
    %c0_i32_1 = arith.constant 0 : i32
    return %arg0, %c0_i32, %c0_i32_0 : i32, i32, i32
  }
  func.func @transform_2(%arg0: i32, %arg1: i32) -> (i32, i32) {
    %c0_i32 = arith.constant 0 : i32
    %c0_i32_0 = arith.constant 0 : i32
    %c0_i32_1 = arith.constant 0 : i32
    return %c0_i32, %c0_i32_0 : i32, i32
  }
  func.func @transform_3(%arg0: i32, %arg1: i32) -> (i32, i32) {
    %c0_i32 = arith.constant 0 : i32
    %c0_i32_0 = arith.constant 0 : i32
    %c0_i32_1 = arith.constant 0 : i32
    return %c0_i32, %c0_i32_0 : i32, i32
  }
  func.func @transform_4(%arg0: i32, %arg1: i32) -> (i32, i32) {
    %c0_i32 = arith.constant 0 : i32
    %c0_i32_0 = arith.constant 0 : i32
    %c0_i32_1 = arith.constant 0 : i32
    return %c0_i32, %c0_i32_0 : i32, i32
  }
  func.func @transform_5(%arg0: i32, %arg1: i32) -> (i32, i32) {
    %c0_i32 = arith.constant 0 : i32
    %c0_i32_0 = arith.constant 0 : i32
    %c0_i32_1 = arith.constant 0 : i32
    return %c0_i32, %c0_i32_0 : i32, i32
  }
  func.func @transform_6(%arg0: i32, %arg1: i32) -> (i32, i32) {
    %c0_i32 = arith.constant 0 : i32
    %c0_i32_0 = arith.constant 0 : i32
    %c0_i32_1 = arith.constant 0 : i32
    return %c0_i32, %c0_i32_0 : i32, i32
  }
  func.func @transform_7(%arg0: i32, %arg1: i32) -> (i32, i32) {
    %c0_i32 = arith.constant 0 : i32
    %c0_i32_0 = arith.constant 0 : i32
    %c0_i32_1 = arith.constant 0 : i32
    return %c0_i32, %c0_i32_0 : i32, i32
  }
  func.func @transform_8(%arg0: i32, %arg1: i32) -> (i32, i32) {
    %c0_i32 = arith.constant 0 : i32
    %c0_i32_0 = arith.constant 0 : i32
    %c0_i32_1 = arith.constant 0 : i32
    return %c0_i32, %c0_i32_0 : i32, i32
  }
  func.func @transform_9(%arg0: i32, %arg1: i32) -> (i32, i32, i32) {
    %c0_i32 = arith.constant 0 : i32
    %c0_i32_0 = arith.constant 0 : i32
    return %arg0, %arg1, %c0_i32 : i32, i32, i32
  }
}

</mosaic_0001>

<bundles_post_ra>
// kernel: tpu_custom_call.1
= control target key start
LH: loop header
LB: loop body
LE: loop exit
PB: predicated region body
PF: predicated region fallthrough
CT: control target
= control target key end

     0   :  { %s1914_s0 = inlined_call_operand.vmem [shape: f32[2,8,32], index: 0, kind: input, shape index: {}]   ;;  %s1915_s1 = inlined_call_operand.vmem [shape: f32[2,128,32], index: 1, kind: input, shape index: {}]   ;;  %s1916_s2 = inlined_call_operand.vmem [shape: f32[1,128], index: 2, kind: input, shape index: {}]   ;;  %s1917_s3 = inlined_call_operand.vmem [shape: bf16[32,32], index: 3, kind: input, shape index: {}]   ;;  %s1918_s4 = inlined_call_operand.vmem [shape: f32[1,32], index: 4, kind: input, shape index: {}]   ;;  %s1919_s5 = inlined_call_operand.vmem [shape: bf16[32,64], index: 5, kind: input, shape index: {}]   ;;  %s1920_s6 = inlined_call_operand.vmem [shape: f32[1,64], index: 6, kind: input, shape index: {}]   ;;  %s1921_s7 = inlined_call_operand.vmem [shape: bf16[32,32], index: 7, kind: input, shape index: {}]   ;;  %s1922_s8 = inlined_call_operand.vmem [shape: f32[1,32], index: 8, kind: input, shape index: {}]   ;;  %s1923_s9 = inlined_call_operand.hbm [shape: f32[2,8,32], index: 9, kind: output, shape index: {}]  }
   0x1   :  { %1924 = sst [smem:[#allocation7_spill]] %s1914_s0 }
   0x2   :  { %1925 = sst [smem:[#allocation8_spill]] %s1915_s1 }
   0x3   :  { %14 = vsyncpa [#allocation5], 0 }
   0x4   :  { %16 = vsyncpa [#allocation5 + $0x1], 0  ;;  %s1532_s30 = smov 0   ;;  %s1534_s10 = smov 0  }
   0x5   :  { %s1536_s11 = smov 0   ;;  %s1538_s12 = smov 0  }
   0x6   :  { %s1540_s13 = smov 0   ;;  %s1542_s14 = smov 0  }
   0x7 LB: > { %s1247_s15 = sadd.s32 4294967295, %s1470_s14   ;;  %s1248_s16 = sadd.s32 4294967294, %s1470_s14   ;;  %s1470_s14 = sphi %s1542_s14, %s22_s14   ;;  %s1466_s13 = sphi %s1540_s13, %s1934_s13   ;;  %s1462_s12 = sphi %s1538_s12, %s1933_s12   ;;  %s1458_s11 = sphi %s1536_s11, %s1932_s11   ;;  %s1454_s10 = sphi %s1534_s10, %s1931_s10   ;;  %s1450_s30 = sphi %s1532_s30, %s1930_s30  }
   0x8   : > { %s34_s17 = sadd.s32 1, %s1466_s13  ;;  %s244_s18 = sadd.s32 1, %s1458_s11 }
   0x9   : > { %p36_p0 = scmp.ge.s32.totalorder %s34_s17, 2  ;;  %p254_p1 = scmp.ne.s32.totalorder %s1458_s11, %s1454_s10 }
   0xa   : > { %p255_p2 = scmp.eq.s32.totalorder %s1247_s15, 1  ;;  %p260_p3 = scmp.ne.s32.totalorder %s1454_s10, %s1450_s30 }
   0xb   : > { %s1936_s17 = smov (%p36_p0, %s34_s17), 0  ;;  %p261_p5 = scmp.eq.s32.totalorder %s1248_s16, 1 }
   0xc   : > { %p1572_p4 = por %p255_p2, %p254_p1  ;;  %s239_s20 = ssub.s32 %s1466_s13, %s1936_s17 }
   0xd   : > { %p1251_p6 = scmp.ge.s32.totalorder %s1470_s14, 1  ;;  %p242_p7 = scmp.eq.s32.totalorder %s239_s20, 0 }
   0xe   : > { %p1579_p8 = por %p261_p5, %p260_p3  ;;  %p318_p9 = scmp.lt.s32.totalorder %s1470_s14, 3 }
   0xf   : > { %s1585_s22 = scalar_select %p242_p7, %s1458_s11, %s244_s18  }
  0x10   : > { %p319_p10 = pnand %p1251_p6, %p318_p9 }
  0x11   : > { %p361_p11 = scmp.lt.s32.totalorder (!%p319_p10), %s1462_s12, 1  ;;  %s1928_s1 = sld [smem:[#allocation8_spill]] (!%p319_p10) }
  0x12   : > { %322 = sbr.rel (%p319_p10) target bundleno = 1248 (0x4e0), region = 56  ;;  %s1929_s0 = sld [smem:[#allocation7_spill]] (!%p319_p10) }
  0x13   : > { %s1473_s18 = smov (!%p319_p10), 120   ;;  %s1474_s20 = smov (!%p319_p10), 104  }
  0x14   : > { %s1475_s25 = smov (!%p319_p10), 96   ;;  %s1476_s26 = smov (!%p319_p10), 88  }
  0x17   : > { %v1300_v0 = vld [vmem:[%s1919_s5 + $0x8] sm:$0xff]  ;;  %v1299_v1 = vld [vmem:[%s1919_s5] sm:$0xff]  ;;  %s1595_s27 = scalar_select %p361_p11, %s1462_s12, 1  ;;  %vm422_vm0 = vcmask 261120   ;;  %vm496_vm1 = vcmask 523264   ;;  %vm581_vm2 = vcmask 64512  }
  0x18   : > { %453 = vmatpush.bf16.msra.mxu0 %v1300_v0  ;;  %1305 = vmatpush.bf16.msra.mxu1 %v1300_v0  ;;  %v1302_v26 = vld [vmem:[%s1917_s3 + $0x8] sm:$0xff]  ;;  %v1634_v27 = vld [vmem:[%s1920_s6] ss:$0 sm:$0xff]  ;;  %vm820_vm3 = vcmask 130112   ;;  %vm963_vm4 = vcmask 195712   ;;  %vm1106_vm5 = vcmask 261312  }
  0x19   : > { %s1298_s28 = sshll.u32 %s1595_s27, 7  ;;  %s1253_s23 = sshll.u32 %s1595_s27, 3  ;;  %v1301_v28 = vld [vmem:[%s1917_s3] sm:$0xff] }
  0x1a   : > { %s1601_s16 = scalar_lea.vmem %s1928_s1, %s1298_s28  ;;  %s367_s29 = scalar_lea.vmem %s1929_s0, %s1253_s23 }
  0x1b   : > { %v378_v2 = vld [vmem:[%s1601_s16] sm:$0xff]  ;;  %v379_v3 = vld [vmem:[%s1601_s16 + $0x8] sm:$0xff]  ;;  %v380_v5 = vld [vmem:[%s1601_s16 + $0x10] sm:$0xff]  ;;  %s1472_s27 = smov 112   ;;  %s1477_s28 = smov 80  }
  0x1c   : > { %454 = vmatpush.bf16.msra.mxu0 %v1299_v1  ;;  %1306 = vmatpush.bf16.msra.mxu1 %v1299_v1  ;;  %v394_v4 = vpack.c.bf16 %v379_v3, %v378_v2  ;;  %v381_v6 = vld [vmem:[%s1601_s16 + $0x18] sm:$0xff]  ;;  %v382_v8 = vld [vmem:[%s1601_s16 + $0x20] sm:$0xff]  ;;  %v383_v9 = vld [vmem:[%s1601_s16 + $0x28] sm:$0xff] }
  0x1d   : > { %v395_v7 = vpack.c.bf16 %v381_v6, %v380_v5  ;;  %v396_v10 = vpack.c.bf16 %v383_v9, %v382_v8  ;;  %v392_v11 = vld [vmem:[%s1601_s16 + $0x70] sm:$0xff]  ;;  %v393_v12 = vld [vmem:[%s1601_s16 + $0x78] sm:$0xff]  ;;  %v386_v17 = vld [vmem:[%s1601_s16 + $0x40] sm:$0xff] }
  0x1e   : > { %v401_v13 = vpack.c.bf16 %v393_v12, %v392_v11  ;;  %v384_v14 = vld [vmem:[%s1601_s16 + $0x30] sm:$0xff]  ;;  %v385_v15 = vld [vmem:[%s1601_s16 + $0x38] sm:$0xff]  ;;  %v387_v18 = vld [vmem:[%s1601_s16 + $0x48] sm:$0xff] }
  0x1f   : > { %1264 = vmatmul.msk.bf16.vlgmr.msra.gmra.mxu0 %vm422_vm0, %v394_v4  ;;  %v397_v16 = vpack.c.bf16 %v385_v15, %v384_v14  ;;  %v398_v19 = vpack.c.bf16 %v387_v18, %v386_v17  ;;  %v388_v20 = vld [vmem:[%s1601_s16 + $0x50] sm:$0xff]  ;;  %v389_v21 = vld [vmem:[%s1601_s16 + $0x58] sm:$0xff]  ;;  %v390_v23 = vld [vmem:[%s1601_s16 + $0x60] sm:$0xff] }
  0x20   : > { %1271 = vmatmul.msk.bf16.vlgmr.msra.gmra.mxu1 %vm422_vm0, %v401_v13  ;;  %v399_v22 = vpack.c.bf16 %v389_v21, %v388_v20  ;;  %v391_v24 = vld [vmem:[%s1601_s16 + $0x68] sm:$0xff]  ;;  %v513_v30 = vld [vmem:[%s367_s29] sm:$0xff]  ;;  %s1478_s29 = smov 72  }
  0x21   : > { %v400_v25 = vpack.c.bf16 %v391_v24, %v390_v23  ;;  %545 = vmatpush.bf16.msrb.mxu1 %v1302_v26  ;;  %v514_v32 = vpack.c.bf16 %v513_v30, %v513_v30 }
  0x25   : > { %546 = vmatpush.bf16.msrb.mxu1 %v1301_v28 }
  0x2f   : > { %1265 = vmatmul.msk.bf16.gmra.mxu0 %vm422_vm0, %v395_v7 }
  0x30   : > { %1280 = vmatmul.msk.bf16.vlgmr.msrb.gmra.mxu1 %vm422_vm0, %v514_v32 }
  0x3f   : > { %1266 = vmatmul.msk.bf16.gmra.mxu0 %vm422_vm0, %v396_v10 }
  0x4f   : > { %1267 = vmatmul.msk.bf16.gmra.mxu0 %vm422_vm0, %v397_v16 }
  0x5f   : > { %1268 = vmatmul.msk.bf16.gmra.mxu0 %vm422_vm0, %v398_v19 }
  0x6f   : > { %1269 = vmatmul.msk.bf16.gmra.mxu0 %vm422_vm0, %v399_v22 }
  0x7f   : > { %1270 = vmatmul.msk.bf16.gmra.mxu0 %vm422_vm0, %v400_v25 }
  0x9c   : > { %v456_v29 = vpop.f32.mrf.mxu0 }
  0x9d   : > { %v457_v31 = vadd.f32 %v1634_v27, %v456_v29  ;;  %v491_v40 = vpop.f32.mrf.mxu1 }
  0x9e   : > { %v492_v42 = vadd.f32 %v1634_v27, %v491_v40 }
  0x9f   : > { %497 = vst.msk [vmem:[#allocation2] sm:$0xff] %vm496_vm1, %v457_v31  ;;  %v1373_v31 = vld [vmem:[%s1918_s4] ss:$0 sm:$0xff] }
  0xa0   : > { %511 = vst.msk [vmem:[#allocation2 + $0x70] sm:$0xff] %vm496_vm1, %v492_v42 }
  0xa4   : > { %v458_v33 = vpop.f32.mrf.mxu0 }
  0xa5   : > { %v459_v34 = vadd.f32 %v1634_v27, %v458_v33  ;;  %v493_v44 = vpop.f32.mrf.mxu1 }
  0xa6   : > { %v494_v46 = vadd.f32 %v1634_v27, %v493_v44  ;;  %v822_v28 = vld [vmem:[#allocation2] sm:$0xff] }
  0xa7   : > { %498 = vst.msk [vmem:[#allocation2 + $0x8] sm:$0xff] %vm496_vm1, %v459_v34  ;;  %v836_v49 = vld [vmem:[#allocation2 + $0x70] sm:$0xff] }
  0xa8   : > { %512 = vst.msk [vmem:[#allocation2 + $0x78] sm:$0xff] %vm496_vm1, %v494_v46 }
  0xac   : > { %v461_v35 = vpop.f32.mrf.mxu0 }
  0xad   : > { %v462_v36 = vadd.f32 %v1634_v27, %v461_v35  ;;  %v548_v17 = vpop.f32.mrf.mxu1 }
  0xae   : > { %v549_v33 = vadd.f32 %v1373_v31, %v548_v17  ;;  %v1374_v31 = vld [vmem:[%s1916_s2] ss:$0 sm:$0xff] }
  0xaf   : > { %499 = vst.msk [vmem:[#allocation2 + $0x10] sm:$0xff] %vm496_vm1, %v462_v36  ;;  %v837_v50 = vld [vmem:[#allocation2 + $0x78] sm:$0xff] }
  0xb0   : > { %v1661_v51 = vpack.c.bf16 %v837_v50, %v836_v49  ;;  %v553_v34 = vpack.c.bf16 %v549_v33, %v549_v33 }
  0xb2   : > { %870 = vrot.lane.b32.xlu1 %v1661_v51, %s1472_s27  ;;  %727 = vrot.lane.b32.xlu0 %v1661_v51, %s1473_s18  ;;  %v607_v56 = vsel %vm581_vm2, %v1661_v51, 0 }
  0xb3   : > { %609 = vmatpush.bf16.xpose.msra.mxu2 %v607_v56 }
  0xb4   : > { %v463_v37 = vpop.f32.mrf.mxu0 }
  0xb5   : > { %v464_v38 = vadd.f32 %v1634_v27, %v463_v37  ;;  %v550_v22 = vpop.f32.mrf.mxu1 }
  0xb6   : > { %v824_v24 = vld [vmem:[#allocation2 + $0x10] sm:$0xff] }
  0xb7   : > { %500 = vst.msk [vmem:[#allocation2 + $0x18] sm:$0xff] %vm496_vm1, %v464_v38 }
  0xbc   : > { %v466_v39 = vpop.f32.mrf.mxu0 }
  0xbd   : > { %v467_v41 = vadd.f32 %v1634_v27, %v466_v39 }
  0xbe   : > { %v825_v23 = vld [vmem:[#allocation2 + $0x18] sm:$0xff] }
  0xbf   : > { %501 = vst.msk [vmem:[#allocation2 + $0x20] sm:$0xff] %vm496_vm1, %v467_v41  ;;  %v1721_v25 = vpack.c.bf16 %v825_v23, %v824_v24 }
  0xc1   : > { %v589_v32 = vsel %vm581_vm2, %v1721_v25, 0 }
  0xc4   : > { %v468_v43 = vpop.f32.mrf.mxu0 }
  0xc5   : > { %v469_v45 = vadd.f32 %v1634_v27, %v468_v43 }
  0xc6   : > { %v826_v19 = vld [vmem:[#allocation2 + $0x20] sm:$0xff] }
  0xc7   : > { %502 = vst.msk [vmem:[#allocation2 + $0x28] sm:$0xff] %vm496_vm1, %v469_v45 }
  0xcc   : > { %v471_v47 = vpop.f32.mrf.mxu0 }
  0xcd   : > { %v472_v48 = vadd.f32 %v1634_v27, %v471_v47 }
  0xce   : > { %v827_v18 = vld [vmem:[#allocation2 + $0x28] sm:$0xff] }
  0xcf   : > { %503 = vst.msk [vmem:[#allocation2 + $0x30] sm:$0xff] %vm496_vm1, %v472_v48  ;;  %v1711_v20 = vpack.c.bf16 %v827_v18, %v826_v19 }
  0xd1   : > { %v592_v30 = vsel %vm581_vm2, %v1711_v20, 0 }
  0xd4   : > { %v473_v52 = vpop.f32.mrf.mxu0 }
  0xd5   : > { %v474_v53 = vadd.f32 %v1634_v27, %v473_v52 }
  0xd6   : > { %v828_v14 = vld [vmem:[#allocation2 + $0x30] sm:$0xff] }
  0xd7   : > { %504 = vst.msk [vmem:[#allocation2 + $0x38] sm:$0xff] %vm496_vm1, %v474_v53 }
  0xdc   : > { %v476_v54 = vpop.f32.mrf.mxu0 }
  0xdd   : > { %v477_v55 = vadd.f32 %v1634_v27, %v476_v54 }
  0xde   : > { %v829_v13 = vld [vmem:[#allocation2 + $0x38] sm:$0xff] }
  0xdf   : > { %505 = vst.msk [vmem:[#allocation2 + $0x40] sm:$0xff] %vm496_vm1, %v477_v55  ;;  %v1701_v15 = vpack.c.bf16 %v829_v13, %v828_v14 }
  0xe1   : > { %v595_v26 = vsel %vm581_vm2, %v1701_v15, 0 }
  0xe4   : > { %v478_v57 = vpop.f32.mrf.mxu0 }
  0xe5   : > { %v479_v58 = vadd.f32 %v1634_v27, %v478_v57 }
  0xe6   : > { %v830_v10 = vld [vmem:[#allocation2 + $0x40] sm:$0xff] }
  0xe7   : > { %506 = vst.msk [vmem:[#allocation2 + $0x48] sm:$0xff] %vm496_vm1, %v479_v58 }
  0xec   : > { %v481_v59 = vpop.f32.mrf.mxu0 }
  0xed   : > { %v482_v60 = vadd.f32 %v1634_v27, %v481_v59 }
  0xee   : > { %v831_v6 = vld [vmem:[#allocation2 + $0x48] sm:$0xff] }
  0xef   : > { %507 = vst.msk [vmem:[#allocation2 + $0x50] sm:$0xff] %vm496_vm1, %v482_v60  ;;  %v1691_v11 = vpack.c.bf16 %v831_v6, %v830_v10 }
  0xf1   : > { %v598_v21 = vsel %vm581_vm2, %v1691_v11, 0 }
  0xf4   : > { %v483_v61 = vpop.f32.mrf.mxu0 }
  0xf5   : > { %v484_v62 = vadd.f32 %v1634_v27, %v483_v61 }
  0xf6   : > { %v688_v1 = vld [vmem:[#allocation2 + $0x50] sm:$0xff] }
  0xf7   : > { %508 = vst.msk [vmem:[#allocation2 + $0x58] sm:$0xff] %vm496_vm1, %v484_v62 }
  0xfc   : > { %v486_v63 = vpop.f32.mrf.mxu0 }
  0xfd   : > { %v487_v0 = vadd.f32 %v1634_v27, %v486_v63 }
  0xfe   : > { %v689_v2 = vld [vmem:[#allocation2 + $0x58] sm:$0xff] }
  0xff   : > { %509 = vst.msk [vmem:[#allocation2 + $0x60] sm:$0xff] %vm496_vm1, %v487_v0  ;;  %v1681_v3 = vpack.c.bf16 %v689_v2, %v688_v1 }
 0x101   : > { %723 = vrot.lane.b32.xlu1 %v1681_v3, %s1473_s18  ;;  %v601_v16 = vsel %vm581_vm2, %v1681_v3, 0 }
 0x104   : > { %v488_v4 = vpop.f32.mrf.mxu0 }
 0x105   : > { %v489_v5 = vadd.f32 %v1634_v27, %v488_v4  ;;  %v823_v27 = vld [vmem:[#allocation2 + $0x8] sm:$0xff] }
 0x106   : > { %v834_v7 = vld [vmem:[#allocation2 + $0x60] sm:$0xff]  ;;  %v1731_v29 = vpack.c.bf16 %v823_v27, %v822_v28 }
 0x107   : > { %510 = vst.msk [vmem:[#allocation2 + $0x68] sm:$0xff] %vm496_vm1, %v489_v5 }
 0x108   : > { %v586_v35 = vsel %vm581_vm2, %v1731_v29, 0 }
 0x109   : > { %866 = vrot.lane.b32.xlu1 %v1681_v3, %s1472_s27 }
 0x10e   : > { %v835_v8 = vld [vmem:[#allocation2 + $0x68] sm:$0xff] }
 0x10f   : > { %v1689_v9 = vpack.c.bf16 %v835_v8, %v834_v7 }
 0x111   : > { %868 = vrot.lane.b32.xlu2 %v1689_v9, %s1472_s27  ;;  %725 = vrot.lane.b32.xlu0 %v1689_v9, %s1473_s18  ;;  %v604_v12 = vsel %vm581_vm2, %v1689_v9, 0 }
 0x112   : > { %864 = vrot.lane.b32.xlu1 %v1691_v11, %s1472_s27  ;;  %610 = vmatpush.bf16.xpose.msra.mxu2 %v604_v12 }
 0x119   : > { %1013 = vrot.lane.b32.xlu2 %v1661_v51, %s1474_s20  ;;  %721 = vrot.lane.b32.xlu0 %v1691_v11, %s1473_s18 }
 0x11a   : > { %862 = vrot.lane.b32.xlu1 %v1701_v15, %s1472_s27  ;;  %611 = vmatpush.bf16.xpose.msra.mxu2 %v601_v16 }
 0x121   : > { %1011 = vrot.lane.b32.xlu2 %v1689_v9, %s1474_s20  ;;  %719 = vrot.lane.b32.xlu0 %v1701_v15, %s1473_s18 }
 0x122   : > { %860 = vrot.lane.b32.xlu1 %v1711_v20, %s1472_s27  ;;  %612 = vmatpush.bf16.xpose.msra.mxu2 %v598_v21 }
 0x124   : > { %v871_v36 = vpop.permute.xlu1 %870  ;;  %v728_v38 = vpop.permute.xlu0 %727 }
 0x125   : > { %v897_v37 = vsel %vm581_vm2, %v871_v36, 0  ;;  %v754_v39 = vsel %vm581_vm2, %v728_v38, 0 }
 0x126   : > { %756 = vmatpush.bf16.xpose.msra.mxu1 %v754_v39 }
 0x129   : > { %1009 = vrot.lane.b32.xlu2 %v1681_v3, %s1474_s20  ;;  %717 = vrot.lane.b32.xlu0 %v1711_v20, %s1473_s18 }
 0x12a   : > { %858 = vrot.lane.b32.xlu1 %v1721_v25, %s1472_s27  ;;  %613 = vmatpush.bf16.xpose.msra.mxu2 %v595_v26 }
 0x131   : > { %1007 = vrot.lane.b32.xlu2 %v1691_v11, %s1474_s20  ;;  %715 = vrot.lane.b32.xlu0 %v1721_v25, %s1473_s18 }
 0x132   : > { %856 = vrot.lane.b32.xlu1 %v1731_v29, %s1472_s27  ;;  %614 = vmatpush.bf16.xpose.msra.mxu2 %v592_v30 }
 0x139   : > { %1005 = vrot.lane.b32.xlu2 %v1701_v15, %s1474_s20  ;;  %713 = vrot.lane.b32.xlu0 %v1731_v29, %s1473_s18 }
 0x13a   : > { %999 = vrot.lane.b32.xlu1 %v1731_v29, %s1474_s20  ;;  %615 = vmatpush.bf16.xpose.msra.mxu2 %v589_v32 }
 0x141   : > { %1003 = vrot.lane.b32.xlu2 %v1711_v20, %s1474_s20  ;;  %703 = vrot.lane.b32.xlu0 %v553_v34, %s1473_s18  ;;  %s1480_s18 = smov 16  }
 0x142   : > { %648 = vrot.lane.b32.xlu1 %v1691_v11, %s1475_s25  ;;  %616 = vmatpush.bf16.xpose.msra.mxu2 %v586_v35 }
 0x149   : > { %1001 = vrot.lane.b32.xlu2 %v1721_v25, %s1474_s20  ;;  %846 = vrot.lane.b32.xlu0 %v553_v34, %s1472_s27  ;;  %s1479_s27 = smov 8  }
 0x14a   : > { %899 = vmatpush.bf16.xpose.msrb.mxu2 %v897_v37  ;;  %644 = vrot.lane.b32.xlu1 %v1711_v20, %s1475_s25 }
 0x14b   : > { %1281 = vmatmul.msk.bf16.vlgmr.msra.gmra.mxu2 %vm581_vm2, %v553_v34 }
 0x151   : > { %989 = vrot.lane.b32.xlu2 %v553_v34, %s1474_s20  ;;  %646 = vrot.lane.b32.xlu0 %v1701_v15, %s1475_s25  ;;  %s1481_s20 = smov 24  }
 0x152   : > { %642 = vrot.lane.b32.xlu1 %v1721_v25, %s1475_s25 }
 0x159   : > { %654 = vrot.lane.b32.xlu2 %v1661_v51, %s1475_s25  ;;  %793 = vrot.lane.b32.xlu0 %v1661_v51, %s1476_s26 }
 0x15a   : > { %640 = vrot.lane.b32.xlu1 %v1731_v29, %s1475_s25 }
 0x161   : > { %650 = vrot.lane.b32.xlu2 %v1681_v3, %s1475_s25  ;;  %789 = vrot.lane.b32.xlu0 %v1681_v3, %s1476_s26 }
 0x162   : > { %785 = vrot.lane.b32.xlu1 %v1701_v15, %s1476_s26 }
 0x169   : > { %934 = vrot.lane.b32.xlu2 %v1689_v9, %s1477_s28  ;;  %787 = vrot.lane.b32.xlu0 %v1691_v11, %s1476_s26 }
 0x16b   : > { %v869_v40 = vpop.permute.xlu2 %868 }
 0x16c   : > { %v894_v41 = vsel %vm581_vm2, %v869_v40, 0 }
 0x16d   : > { %900 = vmatpush.bf16.xpose.msrb.mxu2 %v894_v41 }
 0x171   : > { %1077 = vrot.lane.b32.xlu2 %v1689_v9, %s1478_s29  ;;  %936 = vrot.lane.b32.xlu0 %v1661_v51, %s1477_s28 }
 0x173   : > { %v1014_v42 = vpop.permute.xlu2 %1013  ;;  %v724_v43 = vpop.permute.xlu1 %723 }
 0x174   : > { %v1040_v44 = vsel %vm581_vm2, %v1014_v42, 0  ;;  %v748_v58 = vsel %vm581_vm2, %v724_v43, 0 }
 0x175   : > { %1042 = vmatpush.bf16.xpose.msrb.mxu0 %v1040_v44 }
 0x179   : > { %783 = vrot.lane.b32.xlu0 %v1711_v20, %s1476_s26 }
 0x17b   : > { %v1012_v45 = vpop.permute.xlu2 %1011  ;;  %v867_v46 = vpop.permute.xlu1 %866 }
 0x17c   : > { %v891_v47 = vsel %vm581_vm2, %v867_v46, 0  ;;  %v1037_v48 = vsel %vm581_vm2, %v1012_v45, 0 }
 0x17d   : > { %901 = vmatpush.bf16.xpose.msrb.mxu2 %v891_v47  ;;  %1043 = vmatpush.bf16.xpose.msrb.mxu0 %v1037_v48 }
 0x181   : > { %1079 = vrot.lane.b32.xlu0 %v1661_v51, %s1478_s29 }
 0x183   : > { %v726_v49 = vpop.permute.xlu0 %725  ;;  %v1010_v50 = vpop.permute.xlu2 %1009 }
 0x184   : > { %v751_v52 = vsel %vm581_vm2, %v726_v49, 0  ;;  %v865_v53 = vpop.permute.xlu1 %864  ;;  %v1034_v54 = vsel %vm581_vm2, %v1010_v50, 0 }
 0x185   : > { %757 = vmatpush.bf16.xpose.msra.mxu1 %v751_v52  ;;  %v888_v55 = vsel %vm581_vm2, %v865_v53, 0  ;;  %1044 = vmatpush.bf16.xpose.msrb.mxu0 %v1034_v54 }
 0x186   : > { %902 = vmatpush.bf16.xpose.msrb.mxu2 %v888_v55 }
 0x189   : > { %781 = vrot.lane.b32.xlu0 %v1721_v25, %s1476_s26 }
 0x18b   : > { %v1008_v56 = vpop.permute.xlu2 %1007  ;;  %v722_v57 = vpop.permute.xlu0 %721 }
 0x18c   : > { %v863_v51 = vpop.permute.xlu1 %862  ;;  %v1031_v59 = vsel %vm581_vm2, %v1008_v56, 0  ;;  %v745_v63 = vsel %vm581_vm2, %v722_v57, 0 }
 0x18d   : > { %758 = vmatpush.bf16.xpose.msra.mxu1 %v748_v58  ;;  %v885_v60 = vsel %vm581_vm2, %v863_v51, 0  ;;  %1045 = vmatpush.bf16.xpose.msrb.mxu0 %v1031_v59 }
 0x18e   : > { %903 = vmatpush.bf16.xpose.msrb.mxu2 %v885_v60 }
 0x191   : > { %932 = vrot.lane.b32.xlu0 %v1681_v3, %s1477_s28 }
 0x193   : > { %v1006_v61 = vpop.permute.xlu2 %1005  ;;  %v720_v62 = vpop.permute.xlu0 %719 }
 0x194   : > { %v861_v0 = vpop.permute.xlu1 %860  ;;  %v1028_v1 = vsel %vm581_vm2, %v1006_v61, 0  ;;  %v742_v6 = vsel %vm581_vm2, %v720_v62, 0 }
 0x195   : > { %759 = vmatpush.bf16.xpose.msra.mxu1 %v745_v63  ;;  %v882_v2 = vsel %vm581_vm2, %v861_v0, 0  ;;  %1046 = vmatpush.bf16.xpose.msrb.mxu0 %v1028_v1 }
 0x196   : > { %904 = vmatpush.bf16.xpose.msrb.mxu2 %v882_v2 }
 0x199   : > { %652 = vrot.lane.b32.xlu0 %v1689_v9, %s1475_s25 }
 0x19b   : > { %v1004_v4 = vpop.permute.xlu2 %1003  ;;  %v718_v5 = vpop.permute.xlu0 %717 }
 0x19c   : > { %v859_v7 = vpop.permute.xlu1 %858  ;;  %v1025_v8 = vsel %vm581_vm2, %v1004_v4, 0  ;;  %v739_v14 = vsel %vm581_vm2, %v718_v5, 0 }
 0x19d   : > { %760 = vmatpush.bf16.xpose.msra.mxu1 %v742_v6  ;;  %v879_v10 = vsel %vm581_vm2, %v859_v7, 0  ;;  %1047 = vmatpush.bf16.xpose.msrb.mxu0 %v1025_v8 }
 0x19e   : > { %905 = vmatpush.bf16.xpose.msrb.mxu2 %v879_v10 }
 0x1a1   : > { %791 = vrot.lane.b32.xlu0 %v1689_v9, %s1476_s26 }
 0x1a3   : > { %v1002_v12 = vpop.permute.xlu2 %1001  ;;  %v716_v13 = vpop.permute.xlu0 %715 }
 0x1a4   : > { %v857_v16 = vpop.permute.xlu1 %856  ;;  %v1022_v17 = vsel %vm581_vm2, %v1002_v12, 0  ;;  %v736_v22 = vsel %vm581_vm2, %v716_v13, 0 }
 0x1a5   : > { %761 = vmatpush.bf16.xpose.msra.mxu1 %v739_v14  ;;  %v876_v18 = vsel %vm581_vm2, %v857_v16, 0  ;;  %1048 = vmatpush.bf16.xpose.msrb.mxu0 %v1022_v17 }
 0x1a6   : > { %906 = vmatpush.bf16.xpose.msrb.mxu2 %v876_v18 }
 0x1ab   : > { %v714_v19 = vpop.permute.xlu0 %713  ;;  %v990_v21 = vpop.permute.xlu2 %989 }
 0x1ac   : > { %v1000_v23 = vpop.permute.xlu1 %999  ;;  %v733_v27 = vsel %vm581_vm2, %v714_v19, 0 }
 0x1ad   : > { %762 = vmatpush.bf16.xpose.msra.mxu1 %v736_v22  ;;  %v1019_v9 = vsel %vm581_vm2, %v1000_v23, 0 }
 0x1ae   : > { %1049 = vmatpush.bf16.xpose.msrb.mxu0 %v1019_v9 }
 0x1b3   : > { %v655_v24 = vpop.permute.xlu2 %654  ;;  %v704_v26 = vpop.permute.xlu0 %703 }
 0x1b4   : > { %664 = vmatpush.bf16.msra.mxu3 %v655_v24  ;;  %v649_v46 = vpop.permute.xlu1 %648 }
 0x1b5   : > { %1284 = vmatmul.msk.bf16.vlgmr.msrb.gmra.mxu0 %vm581_vm2, %v990_v21  ;;  %763 = vmatpush.bf16.xpose.msra.mxu1 %v733_v27 }
 0x1bb   : > { %v847_v28 = vpop.permute.xlu0 %846  ;;  %v651_v38 = vpop.permute.xlu2 %650 }
 0x1bc   : > { %1282 = vmatmul.msk.bf16.vlgmr.msra.gmra.mxu1 %vm581_vm2, %v704_v26  ;;  %1283 = vmatmul.msk.bf16.vlgmr.msrb.gmra.mxu2 %vm581_vm2, %v847_v28  ;;  %v645_v48 = vpop.permute.xlu1 %644 }
 0x1c3   : > { %v647_v30 = vpop.permute.xlu0 %646  ;;  %v1838_v41 = vpop.permute.xlu2 %934 }
 0x1c4   : > { %v643_v49 = vpop.permute.xlu1 %642 }
 0x1cb   : > { %v794_v32 = vpop.permute.xlu0 %793  ;;  %v1078_v43 = vpop.permute.xlu2 %1077 }
 0x1cc   : > { %v641_v50 = vpop.permute.xlu1 %640 }
 0x1ce   : > { %v618_v33 = vpop.f32.mrf.mxu2 }
 0x1cf   : > { %v619_v34 = vadd.f32 %v1374_v31, %v618_v33 }
 0x1d1   : > { %622 = vmax.xlane.f32.xlu0 %v619_v34 }
 0x1d3   : > { %v790_v35 = vpop.permute.xlu0 %789 }
 0x1d4   : > { %v786_v54 = vpop.permute.xlu1 %785 }
 0x1d6   : > { %v620_v36 = vpop.f32.mrf.mxu2 }
 0x1db   : > { %v788_v37 = vpop.permute.xlu0 %787 }
 0x1e3   : > { %v1832_v39 = vpop.permute.xlu0 %936 }
 0x1e5   : > { %779 = vrot.lane.b32.xlu0 %v1731_v29, %s1476_s26 }
 0x1eb   : > { %v784_v40 = vpop.permute.xlu0 %783 }
 0x1ed   : > { %928 = vrot.lane.b32.xlu0 %v1701_v15, %s1477_s28 }
 0x1f3   : > { %v1080_v42 = vpop.permute.xlu0 %1079 }
 0x1f4   : > { %1089 = vmatpush.bf16.msrb.mxu1 %v1080_v42 }
 0x1f5   : > { %1073 = vrot.lane.b32.xlu0 %v1691_v11, %s1478_s29 }
 0x1f8   : > { %1090 = vmatpush.bf16.msrb.mxu1 %v1078_v43 }
 0x1fb   : > { %v782_v44 = vpop.permute.xlu0 %781 }
 0x1fd   : > { %926 = vrot.lane.b32.xlu0 %v1711_v20, %s1477_s28 }
 0x203   : > { %v1844_v45 = vpop.permute.xlu0 %932 }
 0x205   : > { %1071 = vrot.lane.b32.xlu0 %v1701_v15, %s1478_s29 }
 0x20b   : > { %v653_v47 = vpop.permute.xlu0 %652 }
 0x20c   : > { %665 = vmatpush.bf16.msra.mxu3 %v653_v47 }
 0x210   : > { %666 = vmatpush.bf16.msra.mxu3 %v651_v38 }
 0x213   : > { %v792_v52 = vpop.permute.xlu0 %791 }
 0x214   : > { %667 = vmatpush.bf16.msra.mxu3 %v649_v46 }
 0x218   : > { %668 = vmatpush.bf16.msra.mxu3 %v647_v30 }
 0x21c   : > { %669 = vmatpush.bf16.msra.mxu3 %v645_v48 }
 0x220   : > { %670 = vmatpush.bf16.msra.mxu3 %v643_v49 }
 0x224   : > { %671 = vmatpush.bf16.msra.mxu3 %v641_v50  ;;  %v1304_v50 = vld [vmem:[%s1921_s7 + $0x8] sm:$0xff] }
 0x228   : > { %803 = vmatpush.bf16.msrb.mxu3 %v794_v32 }
 0x22c   : > { %804 = vmatpush.bf16.msrb.mxu3 %v792_v52  ;;  %v1303_v52 = vld [vmem:[%s1921_s7] sm:$0xff] }
 0x230   : > { %805 = vmatpush.bf16.msrb.mxu3 %v790_v35 }
 0x232   : > { %v1051_v53 = vpop.f32.mrf.mxu0 }
 0x233   : > { %v1052_v59 = vadd.f32 %v1374_v31, %v1051_v53 }
 0x234   : > { %806 = vmatpush.bf16.msrb.mxu3 %v788_v37 }
 0x238   : > { %807 = vmatpush.bf16.msrb.mxu3 %v786_v54 }
 0x239   : > { %v765_v15 = vpop.f32.mrf.mxu1 }
 0x23a   : > { %v766_v55 = vadd.f32 %v1374_v31, %v765_v15  ;;  %v1053_v56 = vpop.f32.mrf.mxu0 }
 0x23c   : > { %808 = vmatpush.bf16.msrb.mxu3 %v784_v40  ;;  %769 = vmax.xlane.f32.xlu1 %v766_v55 }
 0x23f   : > { %v908_v57 = vpop.f32.mrf.mxu2 }
 0x240   : > { %809 = vmatpush.bf16.msrb.mxu3 %v782_v44  ;;  %v909_v58 = vadd.f32 %v1374_v31, %v908_v57  ;;  %v1375_v57 = vld [vmem:[%s1922_s8] ss:$0 sm:$0xff] }
 0x241   : > { %v767_v51 = vpop.f32.mrf.mxu1 }
 0x242   : > { %912 = vmax.xlane.f32.xlu2 %v909_v58 }
 0x244   : > { %1055 = vmax.xlane.f32.xlu1 %v1052_v59  ;;  %v623_v61 = vpop.xlane.xlu0 %622 }
 0x245   : > { %v624_v63 = vsub.f32 %v619_v34, %v623_v61 }
 0x247   : > { %v910_v60 = vpop.f32.mrf.mxu2  ;;  %v625_v0 = vmul.f32 1.442695, %v624_v63 }
 0x249   : > { %1376 = vpow2.f32 %v625_v0 }
 0x24f   : > { %v1377_v1 = vpop.eup %1376 }
 0x257   : > { %v780_v62 = vpop.permute.xlu0 %779 }
 0x258   : > { %810 = vmatpush.bf16.msrb.mxu3 %v780_v62 }
 0x25a   : > { %930 = vrot.lane.b32.xlu2 %v1691_v11, %s1477_s28 }
 0x25d   : > { %1075 = vrot.lane.b32.xlu1 %v1681_v3, %s1478_s29 }
 0x25f   : > { %v929_v12 = vpop.permute.xlu0 %928 }
 0x265   : > { %924 = vrot.lane.b32.xlu1 %v1721_v25, %s1477_s28 }
 0x267   : > { %v1074_v17 = vpop.permute.xlu0 %1073 }
 0x26f   : > { %v927_v18 = vpop.permute.xlu0 %926 }
 0x277   : > { %v1072_v21 = vpop.permute.xlu0 %1071 }
 0x283   : > { %627 = vadd.xlane.f32.xlu2 %v1377_v1 }
 0x2af   : > { %v770_v2 = vpop.xlane.xlu1 %769 }
 0x2b0   : > { %v771_v4 = vsub.f32 %v766_v55, %v770_v2 }
 0x2b2   : > { %v772_v5 = vmul.f32 1.442695, %v771_v4 }
 0x2b4   : > { %1378 = vpow2.f32 %v772_v5 }
 0x2b5   : > { %v913_v6 = vpop.xlane.xlu2 %912 }
 0x2b6   : > { %v914_v7 = vsub.f32 %v909_v58, %v913_v6 }
 0x2b7   : > { %v1056_v8 = vpop.xlane.xlu1 %1055 }
 0x2b8   : > { %v915_v10 = vmul.f32 1.442695, %v914_v7  ;;  %v1057_v11 = vsub.f32 %v1052_v59, %v1056_v8 }
 0x2ba   : > { %v1379_v13 = vpop.eup %1378  ;;  %1380 = vpow2.f32 %v915_v10  ;;  %v1058_v3 = vmul.f32 1.442695, %v1057_v11 }
 0x2bb   : > { %774 = vadd.xlane.f32.xlu1 %v1379_v13 }
 0x2bc   : > { %1382 = vpow2.f32 %v1058_v3 }
 0x2bd   : > { %v931_v22 = vpop.permute.xlu2 %930 }
 0x2c0   : > { %v1381_v14 = vpop.eup %1380 }
 0x2c1   : > { %917 = vadd.xlane.f32.xlu2 %v1381_v14 }
 0x2c2   : > { %v1383_v16 = vpop.eup %1382 }
 0x2c3   : > { %1060 = vadd.xlane.f32.xlu0 %v1383_v16 }
 0x2cf   : > { %v1076_v19 = vpop.permute.xlu1 %1075 }
 0x2d0   : > { %1091 = vmatpush.bf16.msrb.mxu1 %v1076_v19 }
 0x2d4   : > { %1069 = vrot.lane.b32.xlu1 %v1711_v20, %s1478_s29  ;;  %1092 = vmatpush.bf16.msrb.mxu1 %v1074_v17 }
 0x2d7   : > { %v925_v20 = vpop.permute.xlu1 %924 }
 0x2d8   : > { %1093 = vmatpush.bf16.msrb.mxu1 %v1072_v21 }
 0x2d9   : > { %1067 = vrot.lane.b32.xlu2 %v1721_v25, %s1478_s29 }
 0x2dc   : > { %922 = vrot.lane.b32.xlu1 %v1731_v29, %s1477_s28  ;;  %s358_s28 = sand.u32 1, %s1454_s10  }
 0x2dd   : > { %s1252_s15 = sshll.u32 %s358_s28, 3 }
 0x2de   : > { %s360_s24 = scalar_lea.vmem [#allocation4], %s1252_s15  ;;  %s1412_s15 = scalar_lea.hbm %s1923_s9, 16 }
 0x2df   : > { %s1161_s25 = sshll.u32 %s360_s24, 4  ;;  %s1162_s25 = int_to_ptr.vmem [resolvable:$true] %s1161_s25 }
 0x2e4   : > { %1065 = vrot.lane.b32.xlu1 %v1731_v29, %s1478_s29  ;;  %s1295_s29 = sshll.u32 %s1462_s12, 3  ;;  %s1148_s12 = scalar_lea.sflag [#allocation5], %s358_s28 }
 0x2f6   : > { %v628_v23 = vpop.xlane.xlu2 %627 }
 0x2f7   : > { %1384 = vrcp.f32 %v628_v23 }
 0x2fd   : > { %v1385_v9 = vpop.eup %1384 }
 0x2fe   : > { %v630_v24 = vmul.f32 %v1385_v9, %v1377_v1 }
 0x300   : > { %v631_v26 = vpack.c.bf16 %v630_v24, %v630_v24 }
 0x302   : > { %672 = vmatmul.bf16.vlgmr.msra.gmra.mxu3 %v631_v26 }
 0x303   : > { %946 = vmatpush.bf16.msra.mxu3 %v1832_v39 }
 0x307   : > { %947 = vmatpush.bf16.msra.mxu3 %v1838_v41 }
 0x30b   : > { %948 = vmatpush.bf16.msra.mxu3 %v1844_v45 }
 0x30f   : > { %949 = vmatpush.bf16.msra.mxu3 %v931_v22 }
 0x313   : > { %950 = vmatpush.bf16.msra.mxu3 %v929_v12 }
 0x317   : > { %951 = vmatpush.bf16.msra.mxu3 %v927_v18 }
 0x31b   : > { %952 = vmatpush.bf16.msra.mxu3 %v925_v20 }
 0x32e   : > { %v775_v25 = vpop.xlane.xlu1 %774 }
 0x32f   : > { %1386 = vrcp.f32 %v775_v25 }
 0x334   : > { %v918_v30 = vpop.xlane.xlu2 %917 }
 0x335   : > { %v1387_v29 = vpop.eup %1386  ;;  %1388 = vrcp.f32 %v918_v30 }
 0x336   : > { %v777_v27 = vmul.f32 %v1387_v29, %v1379_v13  ;;  %v1061_v32 = vpop.xlane.xlu0 %1060 }
 0x337   : > { %1390 = vrcp.f32 %v1061_v32 }
 0x338   : > { %v778_v28 = vpack.c.bf16 %v777_v27, %v777_v27 }
 0x33a   : > { %811 = vmatmul.bf16.vlgmr.msrb.gmra.mxu3 %v778_v28 }
 0x33b   : > { %v1389_v33 = vpop.eup %1388 }
 0x33c   : > { %v1068_v34 = vpop.permute.xlu2 %1067  ;;  %v920_v35 = vmul.f32 %v1389_v33, %v1381_v14 }
 0x33d   : > { %v1391_v38 = vpop.eup %1390 }
 0x33e   : > { %v921_v37 = vpack.c.bf16 %v920_v35, %v920_v35  ;;  %v1063_v39 = vmul.f32 %v1391_v38, %v1383_v16 }
 0x340   : > { %v1064_v41 = vpack.c.bf16 %v1063_v39, %v1063_v39 }
 0x346   : > { %v1070_v31 = vpop.permute.xlu1 %1069 }
 0x347   : > { %1094 = vmatpush.bf16.msrb.mxu1 %v1070_v31 }
 0x34b   : > { %1095 = vmatpush.bf16.msrb.mxu1 %v1068_v34 }
 0x34e   : > { %v923_v36 = vpop.permute.xlu1 %922 }
 0x34f   : > { %953 = vmatpush.bf16.msra.mxu3 %v923_v36 }
 0x352   : > { %954 = vmatmul.bf16.vlgmr.msra.gmra.mxu3 %v921_v37 }
 0x353   : > { %1139 = vmatpush.bf16.msrb.mxu3 %v1304_v50 }
 0x356   : > { %v1066_v40 = vpop.permute.xlu1 %1065 }
 0x357   : > { %1096 = vmatpush.bf16.msrb.mxu1 %v1066_v40  ;;  %1140 = vmatpush.bf16.msrb.mxu3 %v1303_v52 }
 0x35a   : > { %1097 = vmatmul.bf16.vlgmr.msrb.gmra.mxu1 %v1064_v41 }
 0x385   : > { %v673_v42 = vpop.f32.mrf.mxu3 }
 0x386   : > { %677 = vst.msk [vmem:[#allocation3] sm:$0xff] %vm581_vm2, %v673_v42 }
 0x38d   : > { %v675_v43 = vpop.f32.mrf.mxu3 }
 0x3bd   : > { %v812_v44 = vpop.f32.mrf.mxu3 }
 0x3be   : > { %817 = vrot.lane.b32.xlu1 %v812_v44, %s1479_s27 }
 0x3c5   : > { %v814_v45 = vpop.f32.mrf.mxu3 }
 0x3d5   : > { %v955_v46 = vpop.f32.mrf.mxu3 }
 0x3d6   : > { %960 = vrot.lane.b32.xlu1 %v955_v46, %s1480_s18  ;;  %s1159_s18 = scalar_lea.hbm %s1923_s9, %s1295_s29 }
 0x3d7   : > { %v1098_v47 = vpop.f32.mrf.mxu1  ;;  %s1163_s26 = sshll.u32 %s1159_s18, 4  ;;  %s1164_s26 = int_to_ptr.hbm [resolvable:$true] %s1163_s26 }
 0x3d8   : > { %1103 = vrot.lane.b32.xlu2 %v1098_v47, %s1481_s20  ;;  %s1406_s0 = sshra.s32 %s1164_s26, 4  ;;  %s1407_s0 = int_to_ptr.hbm [resolvable:$true] %s1406_s0 }
 0x3d9   : > { %s1408_s1 = scalar_lea.hbm %s1407_s0, 8  ;;  %p1413_p1 = scmp.lt.s32.totalorder %s1407_s0, %s1923_s9 }
 0x3da   : > { %p1409_p12 = scmp.ne.s32.totalorder %s1407_s0, %s1408_s1  ;;  %p1414_p2 = scmp.lt.s32.totalorder %s1412_s15, %s1408_s1 }
 0x3dc   : > { %p1410_p13 = pnand %p1409_p12, %p1572_p4  ;;  %p1415_p3 = por %p1414_p2, %p1413_p1 }
 0x3dd   : > { %v957_v48 = vpop.f32.mrf.mxu3 }
 0x3de   : > { %p1411_p0 = pneg %p1410_p13 }
 0x3df   : > { %v1100_v49 = vpop.f32.mrf.mxu1 }
 0x3e0   : > { %p1416_p5 = pnand %p1415_p3, %p1411_p0 }
 0x430   : > { %v818_v53 = vpop.permute.xlu1 %817 }
 0x431   : > { %821 = vst.msk [vmem:[#allocation3] sm:$0xff] %vm820_vm3, %v818_v53 }
 0x432   : > { %v1104_v15 = vpop.permute.xlu2 %1103 }
 0x448   : > { %v961_v54 = vpop.permute.xlu1 %960 }
 0x449   : > { %964 = vst.msk [vmem:[#allocation3] sm:$0xff] %vm963_vm4, %v961_v54 }
 0x44a   : > { %1107 = vst.msk [vmem:[#allocation3] sm:$0xff] %vm1106_vm5, %v1104_v15 }
 0x451   : > { %v1108_v55 = vld [vmem:[#allocation3] sm:$0xff] }
 0x452   : > { %v1109_v56 = vpack.c.bf16 %v1108_v55, %v1108_v55 }
 0x454   : > { %1293 = vmatmul.msk.bf16.vlgmr.msrb.gmra.mxu3 %vm422_vm0, %v1109_v56 }
 0x4d7   : > { %v1142_v58 = vpop.f32.mrf.mxu3 }
 0x4d8   : > { %v1143_v51 = vadd.f32 %v1375_v57, %v1142_v58 }
 0x4da   : > { %1146 = vst.msk [vmem:[%s360_s24] sm:$0xff] %vm422_vm0, %v1143_v51 }
 0x4db   : > { %1419 = shalt.err (!%p1416_p5)
}
 0x4dc   : > { %1307 = dma.vmem_to_hbm [thread:$0]  (%p1572_p4), %s1162_s25, 128, %s1164_s26, %s1148_s12  }
 0x4df   : > { %v1144_v59 = vpop.f32.mrf.mxu3 }
 0x4e0 PF: > { %p1313_p6 = scmp.ge.s32.totalorder %s1470_s14, 2  ;;  %s1175_s28 = sand.u32 1, %s1450_s30  }
 0x4e1   : > { %s1176_s20 = scalar_lea.sflag [#allocation5], %s1175_s28 }
 0x4e2   : > { %p1310_p7 = pnand %p1313_p6, %p1579_p8 }
 0x4e4   : > { %p1311_p9 = pneg %p1310_p7 }
 0x4e6   : > { %1445 = dma.done.wait (%p1311_p9), %s1176_s20, 128  }
 0x4e7   : > { %1447 = vsyncadd (%p1311_p9), %s1176_s20, 4294967168  ;;  %s22_s14 = sadd.s32 1, %s1470_s14   ;;  %s1930_s30 = smov %s1454_s10 }
 0x4e8   : > { %p19_p10 = scmp.ge.s32.totalorder %s22_s14, 4   ;;  %s1931_s10 = smov %s1458_s11 }
 0x4e9   : > { %s1932_s11 = smov %s1585_s22  ;;  %s1933_s12 = smov %s1466_s13 }
 0x4ea   : > { %s1934_s13 = smov %s1936_s17  ;;  %21 = sbr.rel (!%p19_p10) target bundleno = 7 (0x7), region = 98 }
 0x4ef   :  { %1182 = vsyncpa [#allocation5], 1 }
 0x4f0   :  { %1184 = vsyncpa [#allocation5 + $0x1], 1 }

</bundles_post_ra>
